<compile_context>
chip_gen: v6e
topology: v6e:2x2x1
jax: 0.10.0
libtpu: 0.0.40
codegen_flags: <defaults>
</compile_context>

<pallas_src>
import jax
import jax.numpy as jnp
from jax.experimental import pallas as pl
from jax.experimental.pallas import tpu as pltpu

_LANE = 128
_MAX_BLOCK_BYTES = 8 << 20     # 8 MiB/block -> <=32 MiB live (2 bufs x (in+out))
_VMEM_LIMIT_BYTES = 48 << 20   # > v5e's 16 MiB scoped default, < v7x's 64 MiB physical
_MIN_GRID_STEPS = 4            # >=2 pipelined blocks per TC on v7x's 2 TensorCores
_SUBLANE = {4: 8, 2: 16, 1: 32}  # itemsize -> sublane packing multiple


def _rbf_kernel(x_ref, o_ref):
    # Compute in f32 (VPU mul + EUP exp), cast back on store. Free for this
    # HBM-bound kernel (ample VPU/EUP slack) and matches upcast semantics.
    x = x_ref[...].astype(jnp.float32)
    o_ref[...] = jnp.exp(-(x * x)).astype(o_ref.dtype)


def _choose_tile_rows(rows: int, itemsize: int, sub: int, block_bytes: int) -> int:
    """Pick a row-tile: byte-budgeted, sublane-aligned, >=_MIN_GRID_STEPS steps,
    preferring an exact divisor of `rows` with an even step count."""
    # Bytes-based cap: same multi-MiB block for every dtype.
    cap_rows = max(sub, (block_bytes // (_LANE * itemsize)) // sub * sub)
    # TC-aware step floor: >= _MIN_GRID_STEPS blocks when the input allows it.
    if rows >= _MIN_GRID_STEPS * sub:
        cap_rows = min(cap_rows, max(sub, (rows // _MIN_GRID_STEPS) // sub * sub))
    tr = min(cap_rows, rows)
    tr = max(sub, (tr // sub) * sub)

    # Prefer a nearby tile (within 2x) that divides rows exactly so the final
    # block is full (unmasked vst); prefer an even step count for a balanced
    # 2-TC split on v7x.
    best_any = None
    lo = max(sub, tr // 2)
    for cand in range(tr, lo - 1, -sub):
        if rows % cand == 0:
            if (rows // cand) % 2 == 0:
                return cand
            if best_any is None:
                best_any = cand
    return best_any if best_any is not None else tr


def rbf(x: jax.Array, *, block_bytes: int = _MAX_BLOCK_BYTES,
        min_pallas_size: int = 1 << 16) -> jax.Array:
    """Computes exp(-x**2) elementwise.

    Uses a Pallas TPU kernel on a zero-copy lane-dense (rows, 128) view when
    the input is a floating dtype whose flat size is a multiple of 128 and
    large enough to amortize a kernel launch; otherwise falls back to the
    XLA-fused jnp expression (which also handles integer inputs by promoting
    to float, the only sensible RBF semantics there).
    """
    orig_shape = x.shape
    orig_dtype = x.dtype
    n = x.size

    is_float = jnp.issubdtype(orig_dtype, jnp.floating)
    if (not is_float) or n < max(min_pallas_size, _LANE) or (n % _LANE) != 0:
        return jnp.exp(-jnp.square(x))

    itemsize = jnp.dtype(orig_dtype).itemsize
    sub = _SUBLANE.get(itemsize, 8)
    rows = n // _LANE
    if rows < sub:  # too small for a full sublane tile; let XLA fuse it
        return jnp.exp(-jnp.square(x))

    tr = _choose_tile_rows(rows, itemsize, sub, block_bytes)
    slab = x.reshape(rows, _LANE)      # zero-copy view of the contiguous input
    grid = (pl.cdiv(rows, tr),)        # Pallas masks a partial final block if any

    out = pl.pallas_call(
        _rbf_kernel,
        out_shape=jax.ShapeDtypeStruct((rows, _LANE), orig_dtype),
        grid=grid,
        in_specs=[pl.BlockSpec((tr, _LANE), lambda i: (i, 0))],
        out_specs=pl.BlockSpec((tr, _LANE), lambda i: (i, 0)),
        compiler_params=pltpu.CompilerParams(
            dimension_semantics=("parallel",),
            vmem_limit_bytes=_VMEM_LIMIT_BYTES,
        ),
        cost_estimate=pl.CostEstimate(
            flops=2 * n,                       # negate + multiply
            transcendentals=n,                 # exp
            bytes_accessed=2 * n * itemsize,   # read + write every element
        ),
        # TODO(synk): pass input_output_aliases={0: 0} at call sites where x
        # may be consumed destructively (footprint win, not a bandwidth win).
    )(slab)

    return out.reshape(orig_shape)


if __name__ == "__main__":
    key = jax.random.PRNGKey(0)
    k1, k2, k3 = jax.random.split(key, 3)

    # 1) Small NCHW activation matching the module's typical usage
    #    (2048 elems -> takes the fused-jnp small-input fast path).
    x_small = jax.random.normal(k1, (2, 4, 16, 16), dtype=jnp.float32)
    y_small = jax.block_until_ready(rbf(x_small))
    assert y_small.shape == x_small.shape and y_small.dtype == x_small.dtype
    assert jnp.allclose(y_small, jnp.exp(-jnp.square(x_small)), atol=1e-6, rtol=1e-6)

    # 2) Larger activation exercising the Pallas path: zero-copy reshape,
    #    rows=1152 -> tr=288 (exact divisor), 4-step even "parallel" grid.
    x_big = jax.random.normal(k2, (2, 8, 72, 128), dtype=jnp.float32)
    y_big = jax.block_until_ready(rbf(x_big, min_pallas_size=0))
    assert y_big.shape == x_big.shape and y_big.dtype == x_big.dtype
    assert jnp.allclose(y_big, jnp.exp(-jnp.square(x_big)), atol=1e-6, rtol=1e-6)

    # 3) bf16 input exercising dtype-aware sublane rounding (tr multiple of 16,
    #    4 grid steps) and f32-compute-then-cast inside the kernel.
    x_bf16 = jax.random.normal(k3, (4, 16, 128), dtype=jnp.bfloat16)
    y_bf16 = jax.block_until_ready(rbf(x_bf16, min_pallas_size=0))
    y_bf16_ref = jnp.exp(-jnp.square(x_bf16.astype(jnp.float32))).astype(jnp.bfloat16)
    assert y_bf16.shape == x_bf16.shape and y_bf16.dtype == x_bf16.dtype
    assert jnp.allclose(y_bf16.astype(jnp.float32), y_bf16_ref.astype(jnp.float32),
                        atol=1e-2, rtol=1e-2)

    # 4) Integer input: must NOT take the Pallas-with-int-output path
    #    (exp(-x^2) truncated to int is wrong); falls back to jnp, float out.
    x_int = jnp.arange(-4, 4, dtype=jnp.int32).reshape(2, 4)
    y_int = jax.block_until_ready(rbf(x_int, min_pallas_size=0))
    assert jnp.issubdtype(y_int.dtype, jnp.floating)
    assert jnp.allclose(y_int, jnp.exp(-jnp.square(x_int.astype(jnp.float32))),
                        atol=1e-6, rtol=1e-6)

    print("KERNEL_OK")
</pallas_src>

<mosaic_0001>
module attributes {stable_mosaic.version = 11 : i64} {
  func.func @_rbf_kernel(%arg0: i32, %arg1: memref<288x128xf32, #tpu.memory_space<vmem>>, %arg2: memref<288x128xf32, #tpu.memory_space<vmem>>) attributes {dimension_semantics = [#tpu.dimension_semantics<parallel>], iteration_bounds = array<i64: 4>, scalar_prefetch = 0 : i64, scratch_operands = 0 : i64, tpu.core_type = #tpu.core_type<tc>, window_params = [{transform_indices = @transform_0, window_bounds = array<i64: 288, 128>}, {transform_indices = @transform_1, window_bounds = array<i64: 288, 128>}]} {
    %c0 = arith.constant 0 : index
    %c0_0 = arith.constant 0 : index
    %0 = vector.load %arg1[%c0, %c0_0] : memref<288x128xf32, #tpu.memory_space<vmem>>, vector<288x128xf32>
    %1 = arith.mulf %0, %0 : vector<288x128xf32>
    %cst = arith.constant 0.000000e+00 : f32
    %2 = vector.broadcast %cst : f32 to vector<288x128xf32>
    %3 = arith.subf %2, %1 : vector<288x128xf32>
    %4 = math.exp %3 : vector<288x128xf32>
    %c0_1 = arith.constant 0 : index
    %c0_2 = arith.constant 0 : index
    %5 = vector.load %arg2[%c0_1, %c0_2] : memref<288x128xf32, #tpu.memory_space<vmem>>, vector<288x128xf32>
    tpu.vector_store %arg2[%c0_1, %c0_2], %4 {strides = array<i32>} : memref<288x128xf32, #tpu.memory_space<vmem>>, vector<288x128xf32>,
    return
  }
  func.func @transform_0(%arg0: i32) -> (i32, i32) {
    %c0_i32 = arith.constant 0 : i32
    %c0_i32_0 = arith.constant 0 : i32
    return %arg0, %c0_i32 : i32, i32
  }
  func.func @transform_1(%arg0: i32) -> (i32, i32) {
    %c0_i32 = arith.constant 0 : i32
    %c0_i32_0 = arith.constant 0 : i32
    return %arg0, %c0_i32 : i32, i32
  }
}

</mosaic_0001>

<bundles_post_ra>
// kernel: tpu_custom_call.1
= control target key start
LH: loop header
LB: loop body
LE: loop exit
PB: predicated region body
PF: predicated region fallthrough
CT: control target
= control target key end

     0   :  { %6 = vsyncpa [#allocation3], 0  ;;  %s911_s0 = inlined_call_operand.hbm [shape: f32[1152,128], index: 0, kind: input, shape index: {}]   ;;  %s912_s1 = inlined_call_operand.hbm [shape: f32[1152,128], index: 1, kind: output, shape index: {}]  }
   0x1   :  { %8 = vsyncpa [#allocation3 + $0x1], 0 }
   0x2   :  { %9 = vsyncpa [#allocation4], 0 }
   0x3   :  { %11 = vsyncpa [#allocation4 + $0x1], 0  ;;  %s684_s6 = smov 0   ;;  %s686_s7 = smov 0  }
   0x4   :  { %s688_s8 = smov 0   ;;  %s690_s9 = smov 0  }
   0x5 LB: > { %s705_s10 = sadd.s32 4294967295, %s666_s9   ;;  %s440_s11 = sadd.s32 4294967294, %s666_s9   ;;  %s666_s9 = sphi %s690_s9, %s925_s9   ;;  %s662_s8 = sphi %s688_s8, %s924_s8   ;;  %s658_s7 = sphi %s686_s7, %s923_s7   ;;  %s654_s6 = sphi %s684_s6, %s922_s6  }
   0x6   : > { %s709_s12 = sadd.s32 1, %s666_s9   ;;  %s24_s13 = sadd.s32 1, %s662_s8 }
   0x7   : > { %s21_s14 = ssub.s32 %s666_s9, %s709_s12  ;;  %p31_p0 = scmp.ne.s32.totalorder %s662_s8, %s658_s7 }
   0x8   : > { %p22_p1 = scmp.eq.s32.totalorder %s21_s14, 0  ;;  %p32_p2 = scmp.eq.s32.totalorder %s666_s9, 0 }
   0x9   : > { %p37_p3 = scmp.ne.s32.totalorder %s658_s7, %s654_s6  ;;  %p38_p4 = scmp.eq.s32.totalorder %s705_s10, 0 }
   0xa   : > { %s721_s15 = scalar_select %p22_p1, %s662_s8, %s24_s13  }
   0xb   : > { %p33_p5 = por %p32_p2, %p31_p0  ;;  %p723_p6 = por %p38_p4, %p37_p3 }
   0xc   : > { %p61_p7 = scmp.eq.s32.totalorder %s705_s10, 3  ;;  %p67_p8 = scmp.eq.s32.totalorder %s440_s11, 3 }
   0xd   : > { %s915_s16 = scalar_select %p723_p6, 1, 0 }
   0xe   : > { %p464_p9 = scmp.lt.s32.totalorder %s666_s9, 4  ;;  %p729_p10 = por %p61_p7, %p31_p0 }
   0xf   : > { %p733_p11 = por %p67_p8, %p37_p3  ;;  %s87_s19 = sand.u32 1, %s662_s8  }
  0x10   : > { %s916_s17 = scalar_select %p729_p10, 1, 0 }
  0x11   : > { %s917_s18 = scalar_select %p733_p11, 1, 0 }
  0x12   : > { %s448_s20 = smul.u32 4608, %s666_s9  ;;  %p744_p12 = pnand %p464_p9, %p33_p5 }
  0x13   : > { %s450_s21 = smul.u32 288, %s87_s19  ;;  %s750_s28 = scalar_lea.sflag [#allocation3], %s87_s19 }
  0x14   : > { %s742_s24 = scalar_lea.hbm %s911_s0, %s448_s20  ;;  %p576_p0 = pneg %p744_p12 }
  0x15   : > { %s91_s26 = scalar_lea.vmem [#allocation2], %s450_s21  ;;  %s574_s29 = scalar_lea.hbm %s742_s24, 4608 }
  0x16   : > { %s98_s27 = sshll.u32 %s91_s26, 4  ;;  %p575_p13 = scmp.ne.s32.totalorder %s742_s24, %s574_s29  ;;  %s748_s27 = int_to_ptr.vmem [resolvable:$true] %s98_s27 }
  0x17   : > { %s579_s3 = scalar_lea.hbm %s911_s0, 18432  ;;  %p580_p3 = scmp.lt.s32.totalorder %s742_s24, %s911_s0 }
  0x18   : > { %p577_p1 = pnand %p576_p0, %p575_p13  ;;  %p581_p4 = scmp.lt.s32.totalorder %s579_s3, %s574_s29 }
  0x1a   : > { %p578_p2 = pneg %p577_p1  ;;  %p582_p5 = por %p581_p4, %p580_p3 }
  0x1c   : > { %p583_p7 = pnand %p582_p5, %p578_p2 }
  0x1e   : > { %586 = shalt.err (!%p583_p7)
}
  0x1f   : > { %s587_s11 = scalar_lea.vmem %s748_s27, 4608  ;;  %s668_s13 = smov [#allocation2]  }
  0x20   : > { %p588_p8 = scmp.ne.s32.totalorder %s748_s27, %s587_s11  ;;  %s592_s14 = sshll.u32 %s668_s13, 4  ;;  %s593_s14 = int_to_ptr.vmem [resolvable:$false] %s592_s14 }
  0x21   : > { %s594_s19 = scalar_lea.vmem %s593_s14, 9216  ;;  %p595_p1 = scmp.lt.s32.totalorder %s748_s27, %s593_s14 }
  0x22   : > { %p590_p9 = pnand %p588_p8, %p576_p0  ;;  %p596_p11 = scmp.lt.s32.totalorder %s594_s19, %s587_s11 }
  0x24   : > { %p591_p13 = pneg %p590_p9  ;;  %p597_p10 = por %p596_p11, %p595_p1 }
  0x26   : > { %p598_p6 = pnand %p597_p10, %p591_p13 }
  0x28   : > { %601 = shalt.err (!%p598_p6)
}
  0x29   : > { %s669_s20 = smov 128   ;;  %s670_s21 = smov 8  }
  0x2a   : > { %459 = dma.hbm_to_vmem [thread:$0]  (!%p744_p12), %s742_s24, 4608, %s748_s27, %s750_s28, %s669_s20, %s669_s20, %s670_s21  }
  0x2b   : > { %p444_p0 = scmp.ge.s32.totalorder %s666_s9, 1  ;;  %p106_p2 = scmp.lt.s32.totalorder %s666_s9, 5 }
  0x2d   : > { %p107_p3 = pnand %p444_p0, %p106_p2 }
  0x2e   : > { %s774_s22 = sand.u32 (!%p107_p3), 1, %s658_s7   ;;  %p919_p6 = scmp.ne.s32.totalorder (!%p107_p3), %s915_s16, 0 }
  0x2f   : > { %110 = sbr.rel (%p107_p3) target bundleno = 123 (0x7b), region = 24  ;;  %s113_s26 = scalar_lea.sflag (!%p107_p3), [#allocation3], %s774_s22 }
  0x30   : > { %s451_s23 = smul.u32 (!%p107_p3), 288, %s774_s22 }
  0x32   : > { %s780_s29 = scalar_lea.vmem (!%p107_p3), [#allocation2], %s451_s23 }
  0x34   : > { %645 = dma.done.wait (%p919_p6), %s113_s26, 4608  }
  0x35   : > { %647 = vsyncadd (%p919_p6), %s113_s26, 4294962688  ;;  %v137_v0 = vld [vmem:[%s780_s29] sm:$0xff]  ;;  %v138_v1 = vld [vmem:[%s780_s29 + $0x8] sm:$0xff]  ;;  %s816_s16 = scalar_lea.vmem [#allocation5], %s451_s23  ;;  %s449_s24 = smul.u32 4608, %s705_s10 }
  0x36   : > { %v139_v2 = vld [vmem:[%s780_s29 + $0x10] sm:$0xff]  ;;  %v173_v3 = vmul.f32 %v137_v0, %v137_v0  ;;  %v174_v4 = vmul.f32 %v138_v1, %v138_v1  ;;  %v140_v6 = vld [vmem:[%s780_s29 + $0x18] sm:$0xff]  ;;  %v141_v7 = vld [vmem:[%s780_s29 + $0x20] sm:$0xff]  ;;  %s367_s25 = sshll.u32 %s816_s16, 4  ;;  %s354_s10 = scalar_lea.sflag [#allocation4], %s774_s22  ;;  %s861_s25 = int_to_ptr.vmem [resolvable:$true] %s367_s25 }
  0x37   : > { %v175_v5 = vmul.f32 %v139_v2, %v139_v2  ;;  %v142_v8 = vld [vmem:[%s780_s29 + $0x28] sm:$0xff]  ;;  %v176_v9 = vmul.f32 %v140_v6, %v140_v6  ;;  %v177_v10 = vmul.f32 %v141_v7, %v141_v7  ;;  %v143_v12 = vld [vmem:[%s780_s29 + $0x30] sm:$0xff]  ;;  %v144_v13 = vld [vmem:[%s780_s29 + $0x38] sm:$0xff]  ;;  %s867_s30 = scalar_lea.hbm %s912_s1, %s449_s24  ;;  %s602_s2 = scalar_lea.vmem %s861_s25, 4608 }
  0x38   : > { %v178_v11 = vmul.f32 %v142_v8, %v142_v8  ;;  %v145_v14 = vld [vmem:[%s780_s29 + $0x40] sm:$0xff]  ;;  %v209_v15 = vsub.f32 0.0, %v173_v3  ;;  %v210_v16 = vsub.f32 0.0, %v174_v4  ;;  %v179_v18 = vmul.f32 %v143_v12, %v143_v12  ;;  %v146_v19 = vld [vmem:[%s780_s29 + $0x48] sm:$0xff]  ;;  %v147_v24 = vld [vmem:[%s780_s29 + $0x50] sm:$0xff]  ;;  %p603_p10 = scmp.ne.s32.totalorder %s861_s25, %s602_s2  ;;  %p920_p11 = scmp.ne.s32.totalorder %s916_s17, 0 }
  0x39   : > { %v211_v17 = vsub.f32 0.0, %v175_v5  ;;  %v212_v20 = vsub.f32 0.0, %v176_v9  ;;  %v213_v21 = vsub.f32 0.0, %v177_v10  ;;  %v180_v23 = vmul.f32 %v144_v13, %v144_v13  ;;  %v148_v25 = vld [vmem:[%s780_s29 + $0x58] sm:$0xff]  ;;  %v149_v37 = vld [vmem:[%s780_s29 + $0x60] sm:$0xff]  ;;  %v150_v41 = vld [vmem:[%s780_s29 + $0x68] sm:$0xff] }
  0x3a   : > { %v214_v22 = vsub.f32 0.0, %v178_v11  ;;  %v245_v26 = vmul.f32 1.442695, %v209_v15  ;;  %v247_v27 = vmul.f32 1.442695, %v210_v16  ;;  %v181_v29 = vmul.f32 %v145_v14, %v145_v14  ;;  %v151_v42 = vld [vmem:[%s780_s29 + $0x70] sm:$0xff]  ;;  %p604_p12 = pnand %p603_p10, %p920_p11 }
  0x3b   : > { %v249_v28 = vmul.f32 1.442695, %v211_v17  ;;  %v251_v30 = vmul.f32 1.442695, %v212_v20  ;;  %v253_v31 = vmul.f32 1.442695, %v213_v21  ;;  %v182_v33 = vmul.f32 %v146_v19, %v146_v19 }
  0x3c   : > { %v255_v32 = vmul.f32 1.442695, %v214_v22  ;;  %502 = vpow2.f32 %v245_v26  ;;  %v215_v34 = vsub.f32 0.0, %v179_v18  ;;  %v216_v35 = vsub.f32 0.0, %v180_v23  ;;  %v152_v43 = vld [vmem:[%s780_s29 + $0x78] sm:$0xff]  ;;  %v153_v53 = vld [vmem:[%s780_s29 + $0x80] sm:$0xff]  ;;  %p605_p4 = pneg %p604_p12 }
  0x3d   : > { %v217_v36 = vsub.f32 0.0, %v181_v29  ;;  %504 = vpow2.f32 %v247_v27  ;;  %v218_v38 = vsub.f32 0.0, %v182_v33  ;;  %v183_v39 = vmul.f32 %v147_v24, %v147_v24  ;;  %v154_v54 = vld [vmem:[%s780_s29 + $0x88] sm:$0xff]  ;;  %v155_v61 = vld [vmem:[%s780_s29 + $0x90] sm:$0xff]  ;;  %v156_v1 = vld [vmem:[%s780_s29 + $0x98] sm:$0xff]  ;;  %s671_s3 = smov [#allocation5]  }
  0x3e   : > { %v184_v40 = vmul.f32 %v148_v25, %v148_v25  ;;  %506 = vpow2.f32 %v249_v28  ;;  %v257_v44 = vmul.f32 1.442695, %v215_v34  ;;  %v259_v45 = vmul.f32 1.442695, %v216_v35  ;;  %v157_v2 = vld [vmem:[%s780_s29 + $0xa0] sm:$0xff]  ;;  %v158_v3 = vld [vmem:[%s780_s29 + $0xa8] sm:$0xff] }
  0x3f   : > { %v261_v46 = vmul.f32 1.442695, %v217_v36  ;;  %508 = vpow2.f32 %v251_v30  ;;  %v263_v47 = vmul.f32 1.442695, %v218_v38  ;;  %v219_v48 = vsub.f32 0.0, %v183_v39  ;;  %v159_v13 = vld [vmem:[%s780_s29 + $0xb0] sm:$0xff] }
  0x40   : > { %v220_v49 = vsub.f32 0.0, %v184_v40  ;;  %510 = vpow2.f32 %v253_v31  ;;  %v185_v50 = vmul.f32 %v149_v37, %v149_v37  ;;  %v186_v51 = vmul.f32 %v150_v41, %v150_v41  ;;  %v160_v14 = vld [vmem:[%s780_s29 + $0xb8] sm:$0xff]  ;;  %v161_v21 = vld [vmem:[%s780_s29 + $0xc0] sm:$0xff]  ;;  %v162_v26 = vld [vmem:[%s780_s29 + $0xc8] sm:$0xff]  ;;  %s606_s4 = sshll.u32 %s671_s3, 4  ;;  %s607_s4 = int_to_ptr.vmem [resolvable:$false] %s606_s4 }
  0x41   : > { %v187_v52 = vmul.f32 %v151_v42, %v151_v42  ;;  %512 = vpow2.f32 %v255_v32  ;;  %v265_v55 = vmul.f32 1.442695, %v219_v48  ;;  %v188_v57 = vmul.f32 %v152_v43, %v152_v43  ;;  %v163_v27 = vld [vmem:[%s780_s29 + $0xd0] sm:$0xff]  ;;  %v164_v28 = vld [vmem:[%s780_s29 + $0xd8] sm:$0xff]  ;;  %v165_v41 = vld [vmem:[%s780_s29 + $0xe0] sm:$0xff]  ;;  %s608_s5 = scalar_lea.vmem %s607_s4, 9216  ;;  %p609_p5 = scmp.lt.s32.totalorder %s861_s25, %s607_s4 }
  0x42   : > { %v267_v56 = vmul.f32 1.442695, %v220_v49  ;;  %514 = vpow2.f32 %v257_v44  ;;  %v221_v58 = vsub.f32 0.0, %v185_v50  ;;  %v222_v59 = vsub.f32 0.0, %v186_v51  ;;  %v166_v42 = vld [vmem:[%s780_s29 + $0xe8] sm:$0xff]  ;;  %v167_v51 = vld [vmem:[%s780_s29 + $0xf0] sm:$0xff]  ;;  %p610_p7 = scmp.lt.s32.totalorder %s608_s5, %s602_s2 }
  0x43   : > { %v223_v60 = vsub.f32 0.0, %v187_v52  ;;  %516 = vpow2.f32 %v259_v45  ;;  %v224_v62 = vsub.f32 0.0, %v188_v57  ;;  %v189_v63 = vmul.f32 %v153_v53, %v153_v53  ;;  %v169_v57 = vld [vmem:[%s780_s29 + $0x100] sm:$0xff] }
  0x44   : > { %v190_v0 = vmul.f32 %v154_v54, %v154_v54  ;;  %518 = vpow2.f32 %v261_v46  ;;  %v269_v4 = vmul.f32 1.442695, %v221_v58  ;;  %v271_v5 = vmul.f32 1.442695, %v222_v59  ;;  %v170_v58 = vld [vmem:[%s780_s29 + $0x108] sm:$0xff]  ;;  %p611_p8 = por %p610_p7, %p609_p5 }
  0x45   : > { %v273_v6 = vmul.f32 1.442695, %v223_v60  ;;  %520 = vpow2.f32 %v263_v47  ;;  %v275_v7 = vmul.f32 1.442695, %v224_v62  ;;  %v225_v8 = vsub.f32 0.0, %v189_v63 }
  0x46   : > { %v226_v9 = vsub.f32 0.0, %v190_v0  ;;  %522 = vpow2.f32 %v265_v55  ;;  %v191_v10 = vmul.f32 %v155_v61, %v155_v61  ;;  %v192_v11 = vmul.f32 %v156_v1, %v156_v1  ;;  %p612_p9 = pnand %p611_p8, %p605_p4 }
  0x47   : > { %v193_v12 = vmul.f32 %v157_v2, %v157_v2  ;;  %524 = vpow2.f32 %v267_v56  ;;  %v277_v15 = vmul.f32 1.442695, %v225_v8  ;;  %v194_v17 = vmul.f32 %v158_v3, %v158_v3  ;;  %v168_v56 = vld [vmem:[%s780_s29 + $0xf8] sm:$0xff] }
  0x48   : > { %v279_v16 = vmul.f32 1.442695, %v226_v9  ;;  %526 = vpow2.f32 %v269_v4  ;;  %v227_v18 = vsub.f32 0.0, %v191_v10  ;;  %v228_v19 = vsub.f32 0.0, %v192_v11  ;;  %v172_v8 = vld [vmem:[%s780_s29 + $0x118] sm:$0xff] }
  0x49   : > { %v229_v20 = vsub.f32 0.0, %v193_v12  ;;  %v503_v22 = vpop.eup %502  ;;  %528 = vpow2.f32 %v271_v5  ;;  %v230_v23 = vsub.f32 0.0, %v194_v17  ;;  %v195_v24 = vmul.f32 %v159_v13, %v159_v13 }
  0x4a   : > { %v196_v25 = vmul.f32 %v160_v14, %v160_v14  ;;  %v505_v29 = vpop.eup %504  ;;  %317 = vst [vmem:[%s816_s16] sm:$0xff] %v503_v22  ;;  %530 = vpow2.f32 %v273_v6  ;;  %v281_v30 = vmul.f32 1.442695, %v227_v18  ;;  %v283_v31 = vmul.f32 1.442695, %v228_v19 }
  0x4b   : > { %v285_v32 = vmul.f32 1.442695, %v229_v20  ;;  %v507_v33 = vpop.eup %506  ;;  %318 = vst [vmem:[%s816_s16 + $0x8] sm:$0xff] %v505_v29  ;;  %532 = vpow2.f32 %v275_v7  ;;  %v287_v34 = vmul.f32 1.442695, %v230_v23  ;;  %v231_v35 = vsub.f32 0.0, %v195_v24 }
  0x4c   : > { %v232_v36 = vsub.f32 0.0, %v196_v25  ;;  %v509_v37 = vpop.eup %508  ;;  %319 = vst [vmem:[%s816_s16 + $0x10] sm:$0xff] %v507_v33  ;;  %534 = vpow2.f32 %v277_v15  ;;  %v197_v38 = vmul.f32 %v161_v21, %v161_v21  ;;  %v198_v39 = vmul.f32 %v162_v26, %v162_v26  ;;  %v171_v7 = vld [vmem:[%s780_s29 + $0x110] sm:$0xff] }
  0x4d   : > { %v199_v40 = vmul.f32 %v163_v27, %v163_v27  ;;  %v511_v43 = vpop.eup %510  ;;  %320 = vst [vmem:[%s816_s16 + $0x18] sm:$0xff] %v509_v37  ;;  %536 = vpow2.f32 %v279_v16  ;;  %v289_v44 = vmul.f32 1.442695, %v231_v35  ;;  %v200_v46 = vmul.f32 %v164_v28, %v164_v28 }
  0x4e   : > { %v291_v45 = vmul.f32 1.442695, %v232_v36  ;;  %v513_v47 = vpop.eup %512  ;;  %321 = vst [vmem:[%s816_s16 + $0x20] sm:$0xff] %v511_v43  ;;  %538 = vpow2.f32 %v281_v30  ;;  %v233_v48 = vsub.f32 0.0, %v197_v38  ;;  %v234_v49 = vsub.f32 0.0, %v198_v39 }
  0x4f   : > { %v235_v50 = vsub.f32 0.0, %v199_v40  ;;  %v515_v52 = vpop.eup %514  ;;  %322 = vst [vmem:[%s816_s16 + $0x28] sm:$0xff] %v513_v47  ;;  %540 = vpow2.f32 %v283_v31  ;;  %v236_v53 = vsub.f32 0.0, %v200_v46  ;;  %v201_v54 = vmul.f32 %v165_v41, %v165_v41 }
  0x50   : > { %v202_v55 = vmul.f32 %v166_v42, %v166_v42  ;;  %v517_v59 = vpop.eup %516  ;;  %323 = vst [vmem:[%s816_s16 + $0x30] sm:$0xff] %v515_v52  ;;  %542 = vpow2.f32 %v285_v32  ;;  %v293_v60 = vmul.f32 1.442695, %v233_v48  ;;  %v295_v61 = vmul.f32 1.442695, %v234_v49 }
  0x51   : > { %v297_v62 = vmul.f32 1.442695, %v235_v50  ;;  %v519_v63 = vpop.eup %518  ;;  %324 = vst [vmem:[%s816_s16 + $0x38] sm:$0xff] %v517_v59  ;;  %544 = vpow2.f32 %v287_v34  ;;  %v299_v0 = vmul.f32 1.442695, %v236_v53  ;;  %v237_v1 = vsub.f32 0.0, %v201_v54 }
  0x52   : > { %v238_v2 = vsub.f32 0.0, %v202_v55  ;;  %v521_v3 = vpop.eup %520  ;;  %325 = vst [vmem:[%s816_s16 + $0x40] sm:$0xff] %v519_v63  ;;  %546 = vpow2.f32 %v289_v44  ;;  %v203_v4 = vmul.f32 %v167_v51, %v167_v51  ;;  %v204_v5 = vmul.f32 %v168_v56, %v168_v56 }
  0x53   : > { %v205_v6 = vmul.f32 %v169_v57, %v169_v57  ;;  %v523_v9 = vpop.eup %522  ;;  %326 = vst [vmem:[%s816_s16 + $0x48] sm:$0xff] %v521_v3  ;;  %548 = vpow2.f32 %v291_v45  ;;  %v301_v10 = vmul.f32 1.442695, %v237_v1  ;;  %v206_v12 = vmul.f32 %v170_v58, %v170_v58 }
  0x54   : > { %v303_v11 = vmul.f32 1.442695, %v238_v2  ;;  %v525_v13 = vpop.eup %524  ;;  %327 = vst [vmem:[%s816_s16 + $0x50] sm:$0xff] %v523_v9  ;;  %550 = vpow2.f32 %v293_v60  ;;  %v239_v14 = vsub.f32 0.0, %v203_v4  ;;  %v240_v15 = vsub.f32 0.0, %v204_v5 }
  0x55   : > { %v241_v16 = vsub.f32 0.0, %v205_v6  ;;  %v527_v17 = vpop.eup %526  ;;  %328 = vst [vmem:[%s816_s16 + $0x58] sm:$0xff] %v525_v13  ;;  %552 = vpow2.f32 %v295_v61  ;;  %v242_v18 = vsub.f32 0.0, %v206_v12  ;;  %v207_v19 = vmul.f32 %v171_v7, %v171_v7 }
  0x56   : > { %v208_v20 = vmul.f32 %v172_v8, %v172_v8  ;;  %v529_v21 = vpop.eup %528  ;;  %329 = vst [vmem:[%s816_s16 + $0x60] sm:$0xff] %v527_v17  ;;  %554 = vpow2.f32 %v297_v62  ;;  %v305_v22 = vmul.f32 1.442695, %v239_v14  ;;  %v307_v24 = vmul.f32 1.442695, %v240_v15 }
  0x57   : > { %v531_v23 = vpop.eup %530  ;;  %330 = vst [vmem:[%s816_s16 + $0x68] sm:$0xff] %v529_v21  ;;  %556 = vpow2.f32 %v299_v0  ;;  %v243_v25 = vsub.f32 0.0, %v207_v19  ;;  %v309_v28 = vmul.f32 1.442695, %v241_v16  ;;  %v311_v30 = vmul.f32 1.442695, %v242_v18 }
  0x58   : > { %v244_v26 = vsub.f32 0.0, %v208_v20  ;;  %v533_v27 = vpop.eup %532  ;;  %331 = vst [vmem:[%s816_s16 + $0x70] sm:$0xff] %v531_v23  ;;  %558 = vpow2.f32 %v301_v10 }
  0x59   : > { %v535_v29 = vpop.eup %534  ;;  %332 = vst [vmem:[%s816_s16 + $0x78] sm:$0xff] %v533_v27  ;;  %560 = vpow2.f32 %v303_v11  ;;  %v313_v32 = vmul.f32 1.442695, %v243_v25 }
  0x5a   : > { %v537_v31 = vpop.eup %536  ;;  %333 = vst [vmem:[%s816_s16 + $0x80] sm:$0xff] %v535_v29  ;;  %562 = vpow2.f32 %v305_v22  ;;  %v315_v34 = vmul.f32 1.442695, %v244_v26 }
  0x5b   : > { %v539_v33 = vpop.eup %538  ;;  %334 = vst [vmem:[%s816_s16 + $0x88] sm:$0xff] %v537_v31  ;;  %564 = vpow2.f32 %v307_v24 }
  0x5c   : > { %v541_v35 = vpop.eup %540  ;;  %335 = vst [vmem:[%s816_s16 + $0x90] sm:$0xff] %v539_v33  ;;  %566 = vpow2.f32 %v309_v28 }
  0x5d   : > { %v543_v36 = vpop.eup %542  ;;  %336 = vst [vmem:[%s816_s16 + $0x98] sm:$0xff] %v541_v35  ;;  %568 = vpow2.f32 %v311_v30 }
  0x5e   : > { %v545_v37 = vpop.eup %544  ;;  %337 = vst [vmem:[%s816_s16 + $0xa0] sm:$0xff] %v543_v36  ;;  %570 = vpow2.f32 %v313_v32 }
  0x5f   : > { %v547_v38 = vpop.eup %546  ;;  %338 = vst [vmem:[%s816_s16 + $0xa8] sm:$0xff] %v545_v37  ;;  %572 = vpow2.f32 %v315_v34 }
  0x60   : > { %v549_v39 = vpop.eup %548  ;;  %339 = vst [vmem:[%s816_s16 + $0xb0] sm:$0xff] %v547_v38 }
  0x61   : > { %v551_v40 = vpop.eup %550  ;;  %340 = vst [vmem:[%s816_s16 + $0xb8] sm:$0xff] %v549_v39 }
  0x62   : > { %v553_v41 = vpop.eup %552  ;;  %341 = vst [vmem:[%s816_s16 + $0xc0] sm:$0xff] %v551_v40 }
  0x63   : > { %v555_v42 = vpop.eup %554  ;;  %342 = vst [vmem:[%s816_s16 + $0xc8] sm:$0xff] %v553_v41 }
  0x64   : > { %v557_v43 = vpop.eup %556  ;;  %343 = vst [vmem:[%s816_s16 + $0xd0] sm:$0xff] %v555_v42 }
  0x65   : > { %v559_v44 = vpop.eup %558  ;;  %344 = vst [vmem:[%s816_s16 + $0xd8] sm:$0xff] %v557_v43 }
  0x66   : > { %v561_v45 = vpop.eup %560  ;;  %345 = vst [vmem:[%s816_s16 + $0xe0] sm:$0xff] %v559_v44 }
  0x67   : > { %v563_v46 = vpop.eup %562  ;;  %346 = vst [vmem:[%s816_s16 + $0xe8] sm:$0xff] %v561_v45 }
  0x68   : > { %v565_v47 = vpop.eup %564  ;;  %347 = vst [vmem:[%s816_s16 + $0xf0] sm:$0xff] %v563_v46 }
  0x69   : > { %v567_v48 = vpop.eup %566  ;;  %348 = vst [vmem:[%s816_s16 + $0xf8] sm:$0xff] %v565_v47 }
  0x6a   : > { %v569_v49 = vpop.eup %568  ;;  %349 = vst [vmem:[%s816_s16 + $0x100] sm:$0xff] %v567_v48 }
  0x6b   : > { %v571_v50 = vpop.eup %570  ;;  %350 = vst [vmem:[%s816_s16 + $0x108] sm:$0xff] %v569_v49 }
  0x6c   : > { %v573_v51 = vpop.eup %572  ;;  %351 = vst [vmem:[%s816_s16 + $0x110] sm:$0xff] %v571_v50 }
  0x6d   : > { %352 = vst [vmem:[%s816_s16 + $0x118] sm:$0xff] %v573_v51 }
  0x6e   : > { %615 = shalt.err (!%p612_p9)
}
  0x6f   : > { %s616_s11 = scalar_lea.hbm %s867_s30, 4608  ;;  %s620_s19 = scalar_lea.hbm %s912_s1, 18432 }
  0x70   : > { %p617_p13 = scmp.ne.s32.totalorder %s867_s30, %s616_s11  ;;  %p621_p2 = scmp.lt.s32.totalorder %s867_s30, %s912_s1 }
  0x71   : > { %p622_p3 = scmp.lt.s32.totalorder %s620_s19, %s616_s11 }
  0x72   : > { %p618_p1 = pnand %p617_p13, %p920_p11 }
  0x73   : > { %p623_p6 = por %p622_p3, %p621_p2 }
  0x74   : > { %p619_p0 = pneg %p618_p1 }
  0x76   : > { %p624_p10 = pnand %p623_p6, %p619_p0 }
  0x78   : > { %627 = shalt.err (!%p624_p10)
}
  0x79   : > { %s672_s23 = smov 128   ;;  %s673_s26 = smov 8  }
  0x7a   : > { %454 = dma.vmem_to_hbm [thread:$0]  (%p920_p11), %s861_s25, 4608, %s867_s30, %s354_s10, %s672_s23, %s672_s23, %s673_s26  }
  0x7b PF: > { %p465_p12 = scmp.ge.s32.totalorder %s666_s9, 2  ;;  %s382_s29 = sand.u32 1, %s654_s6  }
  0x7c   : > { %p921_p4 = scmp.ne.s32.totalorder %s917_s18, 0  ;;  %s383_s16 = scalar_lea.sflag [#allocation4], %s382_s29 }
  0x7e   : > { %p461_p5 = pnand %p465_p12, %p921_p4 }
  0x80   : > { %p462_p7 = pneg %p461_p5 }
  0x82   : > { %649 = dma.done.wait (%p462_p7), %s383_s16, 4608  }
  0x83   : > { %651 = vsyncadd (%p462_p7), %s383_s16, 4294962688  ;;  %p14_p8 = scmp.ge.s32.totalorder %s709_s12, 6   ;;  %s922_s6 = smov %s658_s7 }
  0x84   : > { %s923_s7 = smov %s662_s8  ;;  %s924_s8 = smov %s721_s15 }
  0x85   : > { %s925_s9 = smov %s709_s12  ;;  %16 = sbr.rel (!%p14_p8) target bundleno = 5 (0x5), region = 69 }
  0x8a   :  { %388 = vsyncpa [#allocation3], 1 }
  0x8b   :  { %390 = vsyncpa [#allocation3 + $0x1], 1 }
  0x8c   :  { %391 = vsyncpa [#allocation4], 1 }
  0x8d   :  { %393 = vsyncpa [#allocation4 + $0x1], 1 }

</bundles_post_ra>
